<compile_context>
chip_gen: v5e
topology: v5e:2x2
jax: 0.10.0
libtpu: 0.0.40
codegen_flags: <defaults>
</compile_context>

<pallas_src>
import functools

import jax
import jax.numpy as jnp
from jax.experimental import pallas as pl
from jax.experimental.pallas import tpu as pltpu


def _round_up(v, m):
    return ((v + m - 1) // m) * m


def _cdiv(a, b):
    return (a + b - 1) // b


# ----------------------------------------------------------------------------
# Kernel: one (batch tile, K tile) step of   y = relu(x @ W1 + b1) @ W2 + b2
# ----------------------------------------------------------------------------
def _gate_kernel(x_ref, w1_ref, b1_ref, w2_ref, b2_ref, o_ref, acc_ref):
    # x_ref : (TB, TK) bf16     w1_ref: (TK, Hp) bf16    b1_ref: (8, Hp) f32
    # w2_ref: (Hp, Ep) bf16     b2_ref: (8, Ep)  f32     o_ref : (TB, Ep) f32
    # acc_ref: (TB, Hp) f32 scratch -- fc1 partial sums across the K grid axis.
    k = pl.program_id(1)

    @pl.when(k == 0)
    def _():
        acc_ref[...] = jnp.zeros_like(acc_ref)

    acc_ref[...] += jnp.dot(x_ref[...], w1_ref[...],
                            preferred_element_type=jnp.float32)

    @pl.when(k == pl.num_programs(1) - 1)
    def _():
        h = jnp.maximum(acc_ref[...] + b1_ref[0:1, :], 0.0)          # f32 epilogue
        y = jnp.dot(h.astype(jnp.bfloat16), w2_ref[...],
                    preferred_element_type=jnp.float32)
        o_ref[...] = y + b2_ref[0:1, :]


# ----------------------------------------------------------------------------
# Static shape / tiling helpers
# ----------------------------------------------------------------------------
def _gate_dims(F, H, E):
    """Padded feature/hidden/expert dims and the K tile width (all static)."""
    Hp = _round_up(H, 128)
    Ep = _round_up(E, 128)
    Fp = _round_up(F, 128)
    n_k = _cdiv(Fp, 1024)                       # keep W1 / x K-blocks <= ~1K wide
    TK = _round_up(_cdiv(Fp, n_k), 128)
    Fp = n_k * TK                               # zero-padded columns -> exact result
    return Fp, Hp, Ep, TK, n_k


def _vmem_capacity_bytes():
    # v5e/v6e: 128 MiB per TensorCore; v7x: 64 MiB.  Query when possible.
    try:
        info = pltpu.get_tpu_info()
        for attr in ("vmem_capacity_bytes", "vmem_size_bytes", "vmem_bytes"):
            v = getattr(info, attr, None)
            if v:
                return int(v)
    except Exception:
        pass
    return 64 * 1024 * 1024                     # conservative (v7x) fallback


def _block_spec(shape, index_map, buffers=None):
    """BlockSpec with an optional buffer-count request (graceful fallback)."""
    if buffers is not None:
        try:
            return pl.BlockSpec(shape, index_map,
                                pipeline_mode=pl.Buffered(buffers))
        except Exception:
            pass
    return pl.BlockSpec(shape, index_map)


# ----------------------------------------------------------------------------
# One-time weight preparation (hoisted out of the per-call path)
# ----------------------------------------------------------------------------
def prepare_gate_params(w1, b1, w2, b2):
    """Pad to lane-dense shapes and cast weights to bf16, once."""
    F, H = w1.shape
    E = w2.shape[1]
    Fp, Hp, Ep, _, _ = _gate_dims(F, H, E)
    w1p = jnp.pad(w1.astype(jnp.float32),
                  ((0, Fp - F), (0, Hp - H))).astype(jnp.bfloat16)
    w2p = jnp.pad(w2.astype(jnp.float32),
                  ((0, Hp - H), (0, Ep - E))).astype(jnp.bfloat16)
    # Biases as full 8-row sublane groups (row 0 carries the bias, rest zero)
    # so their VMEM loads are unmasked full vregs.
    b1p = jnp.pad(b1.astype(jnp.float32).reshape(1, H), ((0, 7), (0, Hp - H)))
    b2p = jnp.pad(b2.astype(jnp.float32).reshape(1, E), ((0, 7), (0, Ep - E)))
    return w1p, b1p, w2p, b2p


# ----------------------------------------------------------------------------
# Forward pass
# ----------------------------------------------------------------------------
@functools.partial(jax.jit, static_argnames=("num_experts", "max_block_rows",
                                             "single_buffer_weights"))
def gate_forward(x, w1p, b1p, w2p, b2p, *, num_experts,
                 max_block_rows=None, single_buffer_weights=True):
    """x: (N, F) f32 -> (N, num_experts) f32, with pre-padded bf16 weights."""
    N, F = x.shape
    E = num_experts
    Fp, Hp, Ep, TK, n_k = _gate_dims(F, w1p.shape[1], E)
    assert w1p.shape == (Fp, Hp) and w2p.shape == (Hp, Ep)

    # ---- generation-aware tile sizing & VMEM budget -------------------------
    vmem_cap = _vmem_capacity_bytes()
    big_vmem = vmem_cap >= 128 * 1024 * 1024
    vmem_limit = (96 if big_vmem else 32) * 1024 * 1024
    budget = int(0.7 * vmem_limit)
    if max_block_rows is None:
        max_block_rows = 512 if big_vmem else 256

    # >= 2 row tiles when there is enough work so v7x's 2nd TensorCore engages;
    # TB rounding avoids over-padding awkward batch sizes.
    n_row_tiles = max(_cdiv(N, max_block_rows), 2 if N >= 16 else 1)
    TB = _round_up(_cdiv(N, n_row_tiles), 8)

    def footprint(tb):
        weights = ((1 if n_k == 1 else 2) * TK * Hp * 2     # W1 block(s), bf16
                   + Hp * Ep * 2                             # W2 bf16, single-buf
                   + 8 * Hp * 4 + 8 * Ep * 4)                # biases, f32
        per_tile = (2 * tb * TK * 2                          # x bf16, double-buf
                    + 2 * tb * Ep * 4                        # out f32, double-buf
                    + tb * Hp * 4)                           # f32 accumulator
        return weights + per_tile

    while TB > 8 and footprint(TB) > budget:
        TB = max(8, _round_up(TB // 2, 8))

    Np = _round_up(N, TB)

    # Pad x (rows + feature cols are zero -> exact result; padded rows sliced
    # off below) and stream it as bf16 to halve x DMA bytes.
    xp = jnp.pad(x.astype(jnp.float32),
                 ((0, Np - N), (0, Fp - F))).astype(jnp.bfloat16)

    flops = 2 * Np * (Fp * Hp + Hp * Ep)
    bytes_accessed = (Np * Fp * 2 + Fp * Hp * 2 + Hp * Ep * 2
                      + 8 * Hp * 4 + 8 * Ep * 4 + Np * Ep * 4)

    wbuf = 1 if single_buffer_weights else None
    out = pl.pallas_call(
        _gate_kernel,
        out_shape=jax.ShapeDtypeStruct((Np, Ep), jnp.float32),
        grid=(Np // TB, n_k),
        in_specs=[
            pl.BlockSpec((TB, TK), lambda i, k: (i, k)),                 # x tile
            _block_spec((TK, Hp), lambda i, k: (k, 0),
                        buffers=wbuf if n_k == 1 else None),             # W1
            _block_spec((8, Hp), lambda i, k: (0, 0), buffers=wbuf),     # b1
            _block_spec((Hp, Ep), lambda i, k: (0, 0), buffers=wbuf),    # W2
            _block_spec((8, Ep), lambda i, k: (0, 0), buffers=wbuf),     # b2
        ],
        out_specs=pl.BlockSpec((TB, Ep), lambda i, k: (i, 0)),
        scratch_shapes=[pltpu.VMEM((TB, Hp), jnp.float32)],
        compiler_params=pltpu.CompilerParams(
            dimension_semantics=("parallel", "arbitrary"),
            vmem_limit_bytes=vmem_limit),
        cost_estimate=pl.CostEstimate(flops=flops, transcendentals=0,
                                      bytes_accessed=bytes_accessed),
    )(xp, w1p, b1p, w2p, b2p)

    return out[:N, :num_experts]


def run_gate(x, params, num_experts):
    try:
        return gate_forward(x, *params, num_experts=num_experts)
    except Exception:
        # Fallback in case this JAX build rejects single-buffered BlockSpecs.
        return gate_forward(x, *params, num_experts=num_experts,
                            single_buffer_weights=False)


# ----------------------------------------------------------------------------
# Deterministic parameter init (PyTorch Linear is (out, in); we store the
# transposed (in, out) layout so the kernel computes x @ W directly).
# ----------------------------------------------------------------------------
def init_linear(key, fin, fout):
    k_w, k_b = jax.random.split(key)
    bound = 1.0 / float(fin) ** 0.5
    w = jax.random.uniform(k_w, (fin, fout), jnp.float32, -bound, bound)
    b = jax.random.uniform(k_b, (fout,), jnp.float32, -bound, bound)
    return w, b


def gate_reference(x, w1, b1, w2, b2):
    h = jnp.maximum(x @ w1 + b1, 0.0)
    return h @ w2 + b2


# ----------------------------------------------------------------------------
if __name__ == "__main__":
    batch, input_size, hidden_size, num_experts = 2, 64, 50, 10

    key = jax.random.PRNGKey(0)
    k_x, k_fc1, k_fc2, k_x2 = jax.random.split(key, 4)
    x = jax.random.normal(k_x, (batch, input_size), jnp.float32)
    w1, b1 = init_linear(k_fc1, input_size, hidden_size)
    w2, b2 = init_linear(k_fc2, hidden_size, num_experts)

    # One-time weight preparation (padding + bf16 cast hoisted out of forward).
    params = jax.tree_util.tree_map(jax.block_until_ready,
                                    prepare_gate_params(w1, b1, w2, b2))

    out = jax.block_until_ready(run_gate(x, params, num_experts))
    assert out.shape == (batch, num_experts), out.shape
    assert bool(jnp.all(jnp.isfinite(out)))

    ref = gate_reference(x, w1, b1, w2, b2)
    max_err = float(jnp.max(jnp.abs(out - ref)))
    assert max_err < 0.05, f"max abs error {max_err}"

    # Second check: awkward batch size exercising the multi-row-tile path
    # (padding rows sliced off, >=2 grid steps on the 'parallel' axis).
    x2 = jax.random.normal(k_x2, (18, input_size), jnp.float32)
    out2 = jax.block_until_ready(run_gate(x2, params, num_experts))
    ref2 = gate_reference(x2, w1, b1, w2, b2)
    assert out2.shape == (18, num_experts)
    max_err2 = float(jnp.max(jnp.abs(out2 - ref2)))
    assert max_err2 < 0.05, f"max abs error {max_err2}"

    print("KERNEL_OK")
</pallas_src>

<mosaic_0001>
module attributes {stable_mosaic.version = 11 : i64} {
  func.func @_gate_kernel(%arg0: i32, %arg1: i32, %arg2: memref<8x128xbf16, #tpu.memory_space<vmem>>, %arg3: memref<128x128xbf16, #tpu.memory_space<vmem>>, %arg4: memref<8x128xf32, #tpu.memory_space<vmem>>, %arg5: memref<128x128xbf16, #tpu.memory_space<vmem>>, %arg6: memref<8x128xf32, #tpu.memory_space<vmem>>, %arg7: memref<8x128xf32, #tpu.memory_space<vmem>>, %arg8: memref<8x128xf32, #tpu.memory_space<vmem>>) attributes {dimension_semantics = [#tpu.dimension_semantics<parallel>, #tpu.dimension_semantics<arbitrary>], iteration_bounds = array<i64: 1, 1>, scalar_prefetch = 0 : i64, scratch_operands = 1 : i64, tpu.core_type = #tpu.core_type<tc>, window_params = [{transform_indices = @transform_0, window_bounds = array<i64: 8, 128>}, {pipeline_mode = #tpu.pipeline_mode<synchronous>, transform_indices = @transform_1, window_bounds = array<i64: 128, 128>}, {pipeline_mode = #tpu.pipeline_mode<synchronous>, transform_indices = @transform_2, window_bounds = array<i64: 8, 128>}, {pipeline_mode = #tpu.pipeline_mode<synchronous>, transform_indices = @transform_3, window_bounds = array<i64: 128, 128>}, {pipeline_mode = #tpu.pipeline_mode<synchronous>, transform_indices = @transform_4, window_bounds = array<i64: 8, 128>}, {transform_indices = @transform_5, window_bounds = array<i64: 8, 128>}]} {
    %c0_i32 = arith.constant 0 : i32
    %0 = arith.cmpi eq, %arg1, %c0_i32 : i32
    %1 = arith.extui %0 : i1 to i32
    %c0_i32_0 = arith.constant 0 : i32
    %2 = arith.cmpi ne, %1, %c0_i32_0 : i32
    scf.if %2 {
      %cst_10 = arith.constant 0.000000e+00 : f32
      %12 = vector.broadcast %cst_10 : f32 to vector<8x128xf32>
      %c0_11 = arith.constant 0 : index
      %c0_12 = arith.constant 0 : index
      %13 = vector.load %arg8[%c0_11, %c0_12] : memref<8x128xf32, #tpu.memory_space<vmem>>, vector<8x128xf32>
      tpu.vector_store %arg8[%c0_11, %c0_12], %12 {strides = array<i32>} : memref<8x128xf32, #tpu.memory_space<vmem>>, vector<8x128xf32>,
    } else {
    }
    %c0 = arith.constant 0 : index
    %c0_1 = arith.constant 0 : index
    %3 = vector.load %arg8[%c0, %c0_1] : memref<8x128xf32, #tpu.memory_space<vmem>>, vector<8x128xf32>
    %c0_2 = arith.constant 0 : index
    %c0_3 = arith.constant 0 : index
    %4 = vector.load %arg2[%c0_2, %c0_3] : memref<8x128xbf16, #tpu.memory_space<vmem>>, vector<8x128xbf16>
    %c0_4 = arith.constant 0 : index
    %c0_5 = arith.constant 0 : index
    %5 = vector.load %arg3[%c0_4, %c0_5] : memref<128x128xbf16, #tpu.memory_space<vmem>>, vector<128x128xbf16>
    %cst = arith.constant dense<0.000000e+00> : vector<8x128xf32>
    %6 = tpu.matmul %4, %5, %cst {dimension_numbers = #tpu.dot_dimension_numbers<[1], [0], [0], [1], [0, 0, 1, 1], [], []>} : vector<8x128xbf16>, vector<128x128xbf16>, vector<8x128xf32> -> vector<8x128xf32>
    %7 = arith.addf %3, %6 : vector<8x128xf32>
    %c0_6 = arith.constant 0 : index
    %c0_7 = arith.constant 0 : index
    %8 = vector.load %arg8[%c0_6, %c0_7] : memref<8x128xf32, #tpu.memory_space<vmem>>, vector<8x128xf32>
    tpu.vector_store %arg8[%c0_6, %c0_7], %7 {strides = array<i32>} : memref<8x128xf32, #tpu.memory_space<vmem>>, vector<8x128xf32>,
    %c0_i32_8 = arith.constant 0 : i32
    %9 = arith.cmpi eq, %arg1, %c0_i32_8 : i32
    %10 = arith.extui %9 : i1 to i32
    %c0_i32_9 = arith.constant 0 : i32
    %11 = arith.cmpi ne, %10, %c0_i32_9 : i32
    scf.if %11 {
      %c0_10 = arith.constant 0 : index
      %c0_11 = arith.constant 0 : index
      %12 = vector.load %arg8[%c0_10, %c0_11] : memref<8x128xf32, #tpu.memory_space<vmem>>, vector<8x128xf32>
      %c0_12 = arith.constant 0 : index
      %c0_13 = arith.constant 0 : index
      %13 = vector.load %arg4[%c0_12, %c0_13] : memref<8x128xf32, #tpu.memory_space<vmem>>, vector<1x128xf32>
      %14 = vector.broadcast %13 : vector<1x128xf32> to vector<8x128xf32>
      %15 = arith.addf %12, %14 : vector<8x128xf32>
      %cst_14 = arith.constant 0.000000e+00 : f32
      %16 = vector.broadcast %cst_14 : f32 to vector<8x128xf32>
      %17 = arith.maximumf %15, %16 : vector<8x128xf32>
      %18 = arith.truncf %17 : vector<8x128xf32> to vector<8x128xbf16>
      %c0_15 = arith.constant 0 : index
      %c0_16 = arith.constant 0 : index
      %19 = vector.load %arg5[%c0_15, %c0_16] : memref<128x128xbf16, #tpu.memory_space<vmem>>, vector<128x128xbf16>
      %cst_17 = arith.constant dense<0.000000e+00> : vector<8x128xf32>
      %20 = tpu.matmul %18, %19, %cst_17 {dimension_numbers = #tpu.dot_dimension_numbers<[1], [0], [0], [1], [0, 0, 1, 1], [], []>} : vector<8x128xbf16>, vector<128x128xbf16>, vector<8x128xf32> -> vector<8x128xf32>
      %c0_18 = arith.constant 0 : index
      %c0_19 = arith.constant 0 : index
      %21 = vector.load %arg6[%c0_18, %c0_19] : memref<8x128xf32, #tpu.memory_space<vmem>>, vector<1x128xf32>
      %22 = vector.broadcast %21 : vector<1x128xf32> to vector<8x128xf32>
      %23 = arith.addf %20, %22 : vector<8x128xf32>
      %c0_20 = arith.constant 0 : index
      %c0_21 = arith.constant 0 : index
      %24 = vector.load %arg7[%c0_20, %c0_21] : memref<8x128xf32, #tpu.memory_space<vmem>>, vector<8x128xf32>
      tpu.vector_store %arg7[%c0_20, %c0_21], %23 {strides = array<i32>} : memref<8x128xf32, #tpu.memory_space<vmem>>, vector<8x128xf32>,
    } else {
    }
    return
  }
  func.func @transform_0(%arg0: i32, %arg1: i32) -> (i32, i32) {
    %c0_i32 = arith.constant 0 : i32
    return %arg0, %arg1 : i32, i32
  }
  func.func @transform_1(%arg0: i32, %arg1: i32) -> (i32, i32) {
    %c0_i32 = arith.constant 0 : i32
    %c0_i32_0 = arith.constant 0 : i32
    return %arg1, %c0_i32 : i32, i32
  }
  func.func @transform_2(%arg0: i32, %arg1: i32) -> (i32, i32) {
    %c0_i32 = arith.constant 0 : i32
    %c0_i32_0 = arith.constant 0 : i32
    %c0_i32_1 = arith.constant 0 : i32
    return %c0_i32, %c0_i32_0 : i32, i32
  }
  func.func @transform_3(%arg0: i32, %arg1: i32) -> (i32, i32) {
    %c0_i32 = arith.constant 0 : i32
    %c0_i32_0 = arith.constant 0 : i32
    %c0_i32_1 = arith.constant 0 : i32
    return %c0_i32, %c0_i32_0 : i32, i32
  }
  func.func @transform_4(%arg0: i32, %arg1: i32) -> (i32, i32) {
    %c0_i32 = arith.constant 0 : i32
    %c0_i32_0 = arith.constant 0 : i32
    %c0_i32_1 = arith.constant 0 : i32
    return %c0_i32, %c0_i32_0 : i32, i32
  }
  func.func @transform_5(%arg0: i32, %arg1: i32) -> (i32, i32) {
    %c0_i32 = arith.constant 0 : i32
    %c0_i32_0 = arith.constant 0 : i32
    return %arg0, %c0_i32 : i32, i32
  }
}

module attributes {stable_mosaic.version = 11 : i64} {
  func.func @_gate_kernel(%arg0: i32, %arg1: i32, %arg2: memref<8x128xbf16, #tpu.memory_space<vmem>>, %arg3: memref<128x128xbf16, #tpu.memory_space<vmem>>, %arg4: memref<8x128xf32, #tpu.memory_space<vmem>>, %arg5: memref<128x128xbf16, #tpu.memory_space<vmem>>, %arg6: memref<8x128xf32, #tpu.memory_space<vmem>>, %arg7: memref<8x128xf32, #tpu.memory_space<vmem>>, %arg8: memref<8x128xf32, #tpu.memory_space<vmem>>) attributes {dimension_semantics = [#tpu.dimension_semantics<parallel>, #tpu.dimension_semantics<arbitrary>], iteration_bounds = array<i64: 1, 1>, scalar_prefetch = 0 : i64, scratch_operands = 1 : i64, tpu.core_type = #tpu.core_type<tc>, window_params = [{transform_indices = @transform_0, window_bounds = array<i64: 8, 128>}, {transform_indices = @transform_1, window_bounds = array<i64: 128, 128>}, {pipeline_mode = #tpu.pipeline_mode<synchronous>, transform_indices = @transform_2, window_bounds = array<i64: 8, 128>}, {pipeline_mode = #tpu.pipeline_mode<synchronous>, transform_indices = @transform_3, window_bounds = array<i64: 128, 128>}, {pipeline_mode = #tpu.pipeline_mode<synchronous>, transform_indices = @transform_4, window_bounds = array<i64: 8, 128>}, {transform_indices = @transform_5, window_bounds = array<i64: 8, 128>}]} {
    %c0_i32 = arith.constant 0 : i32
    %0 = arith.cmpi eq, %arg1, %c0_i32 : i32
    %1 = arith.extui %0 : i1 to i32
    %c0_i32_0 = arith.constant 0 : i32
    %2 = arith.cmpi ne, %1, %c0_i32_0 : i32
    scf.if %2 {
      %cst_10 = arith.constant 0.000000e+00 : f32
      %12 = vector.broadcast %cst_10 : f32 to vector<8x128xf32>
      %c0_11 = arith.constant 0 : index
      %c0_12 = arith.constant 0 : index
      %13 = vector.load %arg8[%c0_11, %c0_12] : memref<8x128xf32, #tpu.memory_space<vmem>>, vector<8x128xf32>
      tpu.vector_store %arg8[%c0_11, %c0_12], %12 {strides = array<i32>} : memref<8x128xf32, #tpu.memory_space<vmem>>, vector<8x128xf32>,
    } else {
    }
    %c0 = arith.constant 0 : index
    %c0_1 = arith.constant 0 : index
    %3 = vector.load %arg8[%c0, %c0_1] : memref<8x128xf32, #tpu.memory_space<vmem>>, vector<8x128xf32>
    %c0_2 = arith.constant 0 : index
    %c0_3 = arith.constant 0 : index
    %4 = vector.load %arg2[%c0_2, %c0_3] : memref<8x128xbf16, #tpu.memory_space<vmem>>, vector<8x128xbf16>
    %c0_4 = arith.constant 0 : index
    %c0_5 = arith.constant 0 : index
    %5 = vector.load %arg3[%c0_4, %c0_5] : memref<128x128xbf16, #tpu.memory_space<vmem>>, vector<128x128xbf16>
    %cst = arith.constant dense<0.000000e+00> : vector<8x128xf32>
    %6 = tpu.matmul %4, %5, %cst {dimension_numbers = #tpu.dot_dimension_numbers<[1], [0], [0], [1], [0, 0, 1, 1], [], []>} : vector<8x128xbf16>, vector<128x128xbf16>, vector<8x128xf32> -> vector<8x128xf32>
    %7 = arith.addf %3, %6 : vector<8x128xf32>
    %c0_6 = arith.constant 0 : index
    %c0_7 = arith.constant 0 : index
    %8 = vector.load %arg8[%c0_6, %c0_7] : memref<8x128xf32, #tpu.memory_space<vmem>>, vector<8x128xf32>
    tpu.vector_store %arg8[%c0_6, %c0_7], %7 {strides = array<i32>} : memref<8x128xf32, #tpu.memory_space<vmem>>, vector<8x128xf32>,
    %c0_i32_8 = arith.constant 0 : i32
    %9 = arith.cmpi eq, %arg1, %c0_i32_8 : i32
    %10 = arith.extui %9 : i1 to i32
    %c0_i32_9 = arith.constant 0 : i32
    %11 = arith.cmpi ne, %10, %c0_i32_9 : i32
    scf.if %11 {
      %c0_10 = arith.constant 0 : index
      %c0_11 = arith.constant 0 : index
      %12 = vector.load %arg8[%c0_10, %c0_11] : memref<8x128xf32, #tpu.memory_space<vmem>>, vector<8x128xf32>
      %c0_12 = arith.constant 0 : index
      %c0_13 = arith.constant 0 : index
      %13 = vector.load %arg4[%c0_12, %c0_13] : memref<8x128xf32, #tpu.memory_space<vmem>>, vector<1x128xf32>
      %14 = vector.broadcast %13 : vector<1x128xf32> to vector<8x128xf32>
      %15 = arith.addf %12, %14 : vector<8x128xf32>
      %cst_14 = arith.constant 0.000000e+00 : f32
      %16 = vector.broadcast %cst_14 : f32 to vector<8x128xf32>
      %17 = arith.maximumf %15, %16 : vector<8x128xf32>
      %18 = arith.truncf %17 : vector<8x128xf32> to vector<8x128xbf16>
      %c0_15 = arith.constant 0 : index
      %c0_16 = arith.constant 0 : index
      %19 = vector.load %arg5[%c0_15, %c0_16] : memref<128x128xbf16, #tpu.memory_space<vmem>>, vector<128x128xbf16>
      %cst_17 = arith.constant dense<0.000000e+00> : vector<8x128xf32>
      %20 = tpu.matmul %18, %19, %cst_17 {dimension_numbers = #tpu.dot_dimension_numbers<[1], [0], [0], [1], [0, 0, 1, 1], [], []>} : vector<8x128xbf16>, vector<128x128xbf16>, vector<8x128xf32> -> vector<8x128xf32>
      %c0_18 = arith.constant 0 : index
      %c0_19 = arith.constant 0 : index
      %21 = vector.load %arg6[%c0_18, %c0_19] : memref<8x128xf32, #tpu.memory_space<vmem>>, vector<1x128xf32>
      %22 = vector.broadcast %21 : vector<1x128xf32> to vector<8x128xf32>
      %23 = arith.addf %20, %22 : vector<8x128xf32>
      %c0_20 = arith.constant 0 : index
      %c0_21 = arith.constant 0 : index
      %24 = vector.load %arg7[%c0_20, %c0_21] : memref<8x128xf32, #tpu.memory_space<vmem>>, vector<8x128xf32>
      tpu.vector_store %arg7[%c0_20, %c0_21], %23 {strides = array<i32>} : memref<8x128xf32, #tpu.memory_space<vmem>>, vector<8x128xf32>,
    } else {
    }
    return
  }
  func.func @transform_0(%arg0: i32, %arg1: i32) -> (i32, i32) {
    %c0_i32 = arith.constant 0 : i32
    return %arg0, %arg1 : i32, i32
  }
  func.func @transform_1(%arg0: i32, %arg1: i32) -> (i32, i32) {
    %c0_i32 = arith.constant 0 : i32
    %c0_i32_0 = arith.constant 0 : i32
    return %arg1, %c0_i32 : i32, i32
  }
  func.func @transform_2(%arg0: i32, %arg1: i32) -> (i32, i32) {
    %c0_i32 = arith.constant 0 : i32
    %c0_i32_0 = arith.constant 0 : i32
    %c0_i32_1 = arith.constant 0 : i32
    return %c0_i32, %c0_i32_0 : i32, i32
  }
  func.func @transform_3(%arg0: i32, %arg1: i32) -> (i32, i32) {
    %c0_i32 = arith.constant 0 : i32
    %c0_i32_0 = arith.constant 0 : i32
    %c0_i32_1 = arith.constant 0 : i32
    return %c0_i32, %c0_i32_0 : i32, i32
  }
  func.func @transform_4(%arg0: i32, %arg1: i32) -> (i32, i32) {
    %c0_i32 = arith.constant 0 : i32
    %c0_i32_0 = arith.constant 0 : i32
    %c0_i32_1 = arith.constant 0 : i32
    return %c0_i32, %c0_i32_0 : i32, i32
  }
  func.func @transform_5(%arg0: i32, %arg1: i32) -> (i32, i32) {
    %c0_i32 = arith.constant 0 : i32
    %c0_i32_0 = arith.constant 0 : i32
    return %arg0, %c0_i32 : i32, i32
  }
}

</mosaic_0001>

<bundles_post_ra>
// kernel: gate_forward.1
= control target key start
LH: loop header
LB: loop body
LE: loop exit
PB: predicated region body
PF: predicated region fallthrough
CT: control target
= control target key end

     0   :  { %10 = vsyncpa [#allocation4], 0  ;;  %s462_s0 = inlined_call_operand.vmem [shape: bf16[8,128], index: 0, kind: input, shape index: {}]   ;;  %s463_s1 = inlined_call_operand.hbm [shape: bf16[128,128], index: 1, kind: input, shape index: {}]   ;;  %s464_s2 = inlined_call_operand.vmem [shape: f32[8,128], index: 2, kind: input, shape index: {}]   ;;  %s465_s3 = inlined_call_operand.hbm [shape: bf16[128,128], index: 3, kind: input, shape index: {}]   ;;  %s466_s4 = inlined_call_operand.hbm [shape: f32[8,128], index: 4, kind: input, shape index: {}]   ;;  %s467_s5 = inlined_call_operand.vmem [shape: f32[8,128], index: 5, kind: output, shape index: {}]  }
   0x1   :  { %11 = vsyncpa [#allocation6], 0  ;;  %s33_s20 = sshll.u32 %s465_s3, 4  ;;  %s409_s21 = smov [#allocation5]   ;;  %s34_s20 = int_to_ptr.hbm [resolvable:$true] %s33_s20 }
   0x2   :  { %s35_s22 = sshll.u32 %s409_s21, 4  ;;  %s18_s25 = sshll.u32 %s463_s1, 4  ;;  %s36_s22 = int_to_ptr.vmem [resolvable:$true] %s35_s22  ;;  %s19_s25 = int_to_ptr.hbm [resolvable:$true] %s18_s25 }
   0x3   :  { %s410_s26 = smov 64   ;;  %s411_s27 = smov 4  }
   0x4   :  { %41 = dma.hbm_to_vmem [thread:$0]  %s34_s20, 1024, %s36_s22, [#allocation6], %s410_s26, %s410_s26, %s411_s27  }
   0x5   :  { %s412_s28 = smov [#allocation3]   ;;  %s47_s7 = sshll.u32 %s466_s4, 4  ;;  %s48_s7 = int_to_ptr.hbm [resolvable:$true] %s47_s7 }
   0x6   :  { %s20_s29 = sshll.u32 %s412_s28, 4  ;;  %s413_s3 = smov [#allocation7]   ;;  %s21_s29 = int_to_ptr.vmem [resolvable:$true] %s20_s29 }
   0x7   :  { %26 = dma.hbm_to_vmem [thread:$0]  %s19_s25, 1024, %s21_s29, [#allocation4], %s410_s26, %s410_s26, %s411_s27  }
   0x8   :  { %s49_s8 = sshll.u32 %s413_s3, 4  ;;  %s50_s8 = int_to_ptr.vmem [resolvable:$true] %s49_s8 }
   0x9   :  { %52 = dma.hbm_to_vmem [thread:$0]  %s48_s7, 128, %s50_s8, [#allocation6]  }
   0xa   :  { %405 = dma.done.wait [#allocation4], 1024  }
   0xb   :  { %406 = vsyncadd [#allocation4], 4294966272 }
   0xc   :  { %407 = dma.done.wait [#allocation6], 1152  }
   0xd   :  { %408 = vsyncadd [#allocation6], 4294966144  ;;  %v317_v0 = vld [vmem:[#allocation3 + $0x38] sm:$0xff]  ;;  %v316_v1 = vld [vmem:[#allocation3 + $0x30] sm:$0xff] }
   0xe   :  { %136 = vmatpush.bf16.msra.mxu0 %v317_v0  ;;  %v325_v2 = vld [vmem:[#allocation5 + $0x38] sm:$0xff]  ;;  %v324_v3 = vld [vmem:[#allocation5 + $0x30] sm:$0xff]  ;;  %v315_v4 = vld [vmem:[#allocation3 + $0x28] sm:$0xff] }
   0xf   :  { %226 = vmatpush.bf16.msra.mxu1 %v325_v2  ;;  %v323_v5 = vld [vmem:[#allocation5 + $0x28] sm:$0xff]  ;;  %v314_v6 = vld [vmem:[#allocation3 + $0x20] sm:$0xff]  ;;  %v313_v8 = vld [vmem:[#allocation3 + $0x18] sm:$0xff] }
  0x10   :  { %v322_v7 = vld [vmem:[#allocation5 + $0x20] sm:$0xff]  ;;  %v321_v9 = vld [vmem:[#allocation5 + $0x18] sm:$0xff]  ;;  %v312_v10 = vld [vmem:[#allocation3 + $0x10] sm:$0xff] }
  0x11   :  { %v320_v11 = vld [vmem:[#allocation5 + $0x10] sm:$0xff]  ;;  %v311_v12 = vld [vmem:[#allocation3 + $0x8] sm:$0xff]  ;;  %v310_v13 = vld [vmem:[#allocation3] sm:$0xff] }
  0x12   :  { %137 = vmatpush.bf16.msra.mxu0 %v316_v1  ;;  %v71_v14 = vld [vmem:[%s462_s0] sm:$0xf]  ;;  %v319_v15 = vld [vmem:[#allocation5 + $0x8] sm:$0xff] }
  0x13   :  { %227 = vmatpush.bf16.msra.mxu1 %v324_v3  ;;  %v318_v16 = vld [vmem:[#allocation5] sm:$0xff] }
  0x14   :  { %v331_v17 = vld [vmem:[%s464_s2] ss:$0 sm:$0xff] }
  0x15   :  { %v332_v23 = vld [vmem:[#allocation7] ss:$0 sm:$0xff] }
  0x16   :  { %138 = vmatpush.bf16.msra.mxu0 %v315_v4 }
  0x17   :  { %228 = vmatpush.bf16.msra.mxu1 %v323_v5 }
  0x1a   :  { %139 = vmatpush.bf16.msra.mxu0 %v314_v6 }
  0x1b   :  { %229 = vmatpush.bf16.msra.mxu1 %v322_v7 }
  0x1e   :  { %140 = vmatpush.bf16.msra.mxu0 %v313_v8 }
  0x1f   :  { %230 = vmatpush.bf16.msra.mxu1 %v321_v9 }
  0x22   :  { %141 = vmatpush.bf16.msra.mxu0 %v312_v10 }
  0x23   :  { %231 = vmatpush.bf16.msra.mxu1 %v320_v11 }
  0x26   :  { %142 = vmatpush.bf16.msra.mxu0 %v311_v12 }
  0x27   :  { %232 = vmatpush.bf16.msra.mxu1 %v319_v15 }
  0x2a   :  { %143 = vmatpush.bf16.msra.mxu0 %v310_v13 }
  0x2b   :  { %233 = vmatpush.bf16.msra.mxu1 %v318_v16 }
  0x2d   :  { %144 = vmatmul.bf16.vlgmr.msra.gmra.mxu0 %v71_v14 }
  0xaa   :  { %v145_v18 = vpop.f32.mrf.mxu0 }
  0xab   :  { %v157_v19 = vadd.f32 %v331_v17, %v145_v18 }
  0xad   :  { %v158_v20 = vmax.f32 %v157_v19, 0.0 }
  0xaf   :  { %v159_v21 = vpack.c.bf16 %v158_v20, %v158_v20 }
  0xb1   :  { %234 = vmatmul.bf16.vlgmr.msra.gmra.mxu1 %v159_v21 }
  0xb2   :  { %v147_v22 = vpop.f32.mrf.mxu0 }
 0x12e   :  { %v235_v24 = vpop.f32.mrf.mxu1 }
 0x12f   :  { %v236_v25 = vadd.f32 %v332_v23, %v235_v24 }
 0x131   :  { %239 = vst [vmem:[%s467_s5] sm:$0xff] %v236_v25 }
 0x136   :  { %v237_v26 = vpop.f32.mrf.mxu1 }
 0x137   :  { %244 = vsyncpa [#allocation4], 1 }
 0x138   :  { %245 = vsyncpa [#allocation6], 1 }

// kernel: gate_forward.1
= control target key start
LH: loop header
LB: loop body
LE: loop exit
PB: predicated region body
PF: predicated region fallthrough
CT: control target
= control target key end

     0   :  { %10 = vsyncpa [#allocation4], 0  ;;  %s462_s0 = inlined_call_operand.vmem [shape: bf16[8,128], index: 0, kind: input, shape index: {}]   ;;  %s463_s1 = inlined_call_operand.hbm [shape: bf16[128,128], index: 1, kind: input, shape index: {}]   ;;  %s464_s2 = inlined_call_operand.vmem [shape: f32[8,128], index: 2, kind: input, shape index: {}]   ;;  %s465_s3 = inlined_call_operand.hbm [shape: bf16[128,128], index: 3, kind: input, shape index: {}]   ;;  %s466_s4 = inlined_call_operand.hbm [shape: f32[8,128], index: 4, kind: input, shape index: {}]   ;;  %s467_s5 = inlined_call_operand.vmem [shape: f32[8,128], index: 5, kind: output, shape index: {}]  }
   0x1   :  { %11 = vsyncpa [#allocation6], 0  ;;  %s33_s20 = sshll.u32 %s465_s3, 4  ;;  %s409_s21 = smov [#allocation5]   ;;  %s34_s20 = int_to_ptr.hbm [resolvable:$true] %s33_s20 }
   0x2   :  { %s35_s22 = sshll.u32 %s409_s21, 4  ;;  %s18_s25 = sshll.u32 %s463_s1, 4  ;;  %s36_s22 = int_to_ptr.vmem [resolvable:$true] %s35_s22  ;;  %s19_s25 = int_to_ptr.hbm [resolvable:$true] %s18_s25 }
   0x3   :  { %s410_s26 = smov 64   ;;  %s411_s27 = smov 4  }
   0x4   :  { %41 = dma.hbm_to_vmem [thread:$0]  %s34_s20, 1024, %s36_s22, [#allocation6], %s410_s26, %s410_s26, %s411_s27  }
   0x5   :  { %s412_s28 = smov [#allocation3]   ;;  %s47_s7 = sshll.u32 %s466_s4, 4  ;;  %s48_s7 = int_to_ptr.hbm [resolvable:$true] %s47_s7 }
   0x6   :  { %s20_s29 = sshll.u32 %s412_s28, 4  ;;  %s413_s3 = smov [#allocation7]   ;;  %s21_s29 = int_to_ptr.vmem [resolvable:$true] %s20_s29 }
   0x7   :  { %26 = dma.hbm_to_vmem [thread:$0]  %s19_s25, 1024, %s21_s29, [#allocation4], %s410_s26, %s410_s26, %s411_s27  }
   0x8   :  { %s49_s8 = sshll.u32 %s413_s3, 4  ;;  %s50_s8 = int_to_ptr.vmem [resolvable:$true] %s49_s8 }
   0x9   :  { %52 = dma.hbm_to_vmem [thread:$0]  %s48_s7, 128, %s50_s8, [#allocation6]  }
   0xa   :  { %405 = dma.done.wait [#allocation4], 1024  }
   0xb   :  { %406 = vsyncadd [#allocation4], 4294966272 }
   0xc   :  { %407 = dma.done.wait [#allocation6], 1152  }
   0xd   :  { %408 = vsyncadd [#allocation6], 4294966144  ;;  %v317_v0 = vld [vmem:[#allocation3 + $0x38] sm:$0xff]  ;;  %v316_v1 = vld [vmem:[#allocation3 + $0x30] sm:$0xff] }
   0xe   :  { %136 = vmatpush.bf16.msra.mxu0 %v317_v0  ;;  %v325_v2 = vld [vmem:[#allocation5 + $0x38] sm:$0xff]  ;;  %v324_v3 = vld [vmem:[#allocation5 + $0x30] sm:$0xff]  ;;  %v315_v4 = vld [vmem:[#allocation3 + $0x28] sm:$0xff] }
   0xf   :  { %226 = vmatpush.bf16.msra.mxu1 %v325_v2  ;;  %v323_v5 = vld [vmem:[#allocation5 + $0x28] sm:$0xff]  ;;  %v314_v6 = vld [vmem:[#allocation3 + $0x20] sm:$0xff]  ;;  %v313_v8 = vld [vmem:[#allocation3 + $0x18] sm:$0xff] }
  0x10   :  { %v322_v7 = vld [vmem:[#allocation5 + $0x20] sm:$0xff]  ;;  %v321_v9 = vld [vmem:[#allocation5 + $0x18] sm:$0xff]  ;;  %v312_v10 = vld [vmem:[#allocation3 + $0x10] sm:$0xff] }
  0x11   :  { %v320_v11 = vld [vmem:[#allocation5 + $0x10] sm:$0xff]  ;;  %v311_v12 = vld [vmem:[#allocation3 + $0x8] sm:$0xff]  ;;  %v310_v13 = vld [vmem:[#allocation3] sm:$0xff] }
  0x12   :  { %137 = vmatpush.bf16.msra.mxu0 %v316_v1  ;;  %v71_v14 = vld [vmem:[%s462_s0] sm:$0xf]  ;;  %v319_v15 = vld [vmem:[#allocation5 + $0x8] sm:$0xff] }
  0x13   :  { %227 = vmatpush.bf16.msra.mxu1 %v324_v3  ;;  %v318_v16 = vld [vmem:[#allocation5] sm:$0xff] }
  0x14   :  { %v331_v17 = vld [vmem:[%s464_s2] ss:$0 sm:$0xff] }
  0x15   :  { %v332_v23 = vld [vmem:[#allocation7] ss:$0 sm:$0xff] }
  0x16   :  { %138 = vmatpush.bf16.msra.mxu0 %v315_v4 }
  0x17   :  { %228 = vmatpush.bf16.msra.mxu1 %v323_v5 }
  0x1a   :  { %139 = vmatpush.bf16.msra.mxu0 %v314_v6 }
  0x1b   :  { %229 = vmatpush.bf16.msra.mxu1 %v322_v7 }
  0x1e   :  { %140 = vmatpush.bf16.msra.mxu0 %v313_v8 }
  0x1f   :  { %230 = vmatpush.bf16.msra.mxu1 %v321_v9 }
  0x22   :  { %141 = vmatpush.bf16.msra.mxu0 %v312_v10 }
  0x23   :  { %231 = vmatpush.bf16.msra.mxu1 %v320_v11 }
  0x26   :  { %142 = vmatpush.bf16.msra.mxu0 %v311_v12 }
  0x27   :  { %232 = vmatpush.bf16.msra.mxu1 %v319_v15 }
  0x2a   :  { %143 = vmatpush.bf16.msra.mxu0 %v310_v13 }
  0x2b   :  { %233 = vmatpush.bf16.msra.mxu1 %v318_v16 }
  0x2d   :  { %144 = vmatmul.bf16.vlgmr.msra.gmra.mxu0 %v71_v14 }
  0xaa   :  { %v145_v18 = vpop.f32.mrf.mxu0 }
  0xab   :  { %v157_v19 = vadd.f32 %v331_v17, %v145_v18 }
  0xad   :  { %v158_v20 = vmax.f32 %v157_v19, 0.0 }
  0xaf   :  { %v159_v21 = vpack.c.bf16 %v158_v20, %v158_v20 }
  0xb1   :  { %234 = vmatmul.bf16.vlgmr.msra.gmra.mxu1 %v159_v21 }
  0xb2   :  { %v147_v22 = vpop.f32.mrf.mxu0 }
 0x12e   :  { %v235_v24 = vpop.f32.mrf.mxu1 }
 0x12f   :  { %v236_v25 = vadd.f32 %v332_v23, %v235_v24 }
 0x131   :  { %239 = vst [vmem:[%s467_s5] sm:$0xff] %v236_v25 }
 0x136   :  { %v237_v26 = vpop.f32.mrf.mxu1 }
 0x137   :  { %244 = vsyncpa [#allocation4], 1 }
 0x138   :  { %245 = vsyncpa [#allocation6], 1 }

</bundles_post_ra>
